<compile_context>
chip_gen: v5e
topology: v5e:2x2
jax: 0.10.0
libtpu: 0.0.40
codegen_flags: <defaults>
</compile_context>

<pallas_src>
import functools

import jax
import jax.numpy as jnp
from jax.experimental import pallas as pl
from jax.experimental.pallas import tpu as pltpu

EMB_DIM = 64
OUT_FEATURES = 10
OUT_PAD = 128          # lane-dense output width (sliced back to 10 in wrapper)
TILE_N = 8             # token rows per grid step (multiple of 8; raise to
                       # 512-1024 for production-sized N)


# ---------------------------------------------------------------------------
# Kernel 1: one-shot parameter fusion  fused = emb @ W.T + b  (single MXU dot)
# ---------------------------------------------------------------------------
def _fuse_kernel(emb_ref, wt_ref, b_ref, fused_ref):
    # emb_ref  : [V, 64]    f32
    # wt_ref   : [64, 128]  f32  (W.T zero-padded to 128 lanes)
    # b_ref    : [1, 128]   f32  (bias zero-padded)
    # fused_ref: [V, 128]   f32
    fused_ref[...] = (
        jnp.dot(emb_ref[...], wt_ref[...], preferred_element_type=jnp.float32)
        + b_ref[...]
    )


def fuse_params(emb_table, w, b):
    """Run once at parameter setup: returns the fused [V, OUT_PAD] table."""
    v, d = emb_table.shape
    assert d == EMB_DIM
    wt_pad = jnp.zeros((d, OUT_PAD), jnp.float32).at[:, :OUT_FEATURES].set(
        w.T.astype(jnp.float32))
    b_pad = jnp.zeros((1, OUT_PAD), jnp.float32).at[:, :OUT_FEATURES].set(
        b.astype(jnp.float32).reshape(1, -1))
    return pl.pallas_call(
        _fuse_kernel,
        out_shape=jax.ShapeDtypeStruct((v, OUT_PAD), jnp.float32),
        in_specs=[
            pl.BlockSpec(memory_space=pltpu.MemorySpace.VMEM),
            pl.BlockSpec(memory_space=pltpu.MemorySpace.VMEM),
            pl.BlockSpec(memory_space=pltpu.MemorySpace.VMEM),
        ],
        out_specs=pl.BlockSpec(memory_space=pltpu.MemorySpace.VMEM),
    )(emb_table.astype(jnp.float32), wt_pad, b_pad)


# ---------------------------------------------------------------------------
# Kernel 2: forward = row gather of the fused table, tiled over the token axis
# ---------------------------------------------------------------------------
def _gather_kernel(ids_ref, fused_ref, out_ref):
    # ids_ref  : [N_pad]           int32 (SMEM, scalar-prefetched)
    # fused_ref: [V, OUT_PAD]      f32   (VMEM-resident fused table)
    # out_ref  : [TILE_N, OUT_PAD] f32   (lane-dense output tile)
    tile_rows = out_ref.shape[0]
    base = pl.program_id(0) * tile_rows
    for r in range(tile_rows):                 # static unroll; TILE_N is small
        tok = ids_ref[base + r]
        out_ref[pl.ds(r, 1), :] = fused_ref[pl.ds(tok, 1), :]


@functools.partial(jax.jit, static_argnames=("tile_n",))
def mlp3_forward(x_id, fused, *, tile_n=TILE_N):
    """x_id: int [...] token ids; fused: [V, OUT_PAD] from fuse_params."""
    orig_shape = x_id.shape
    v = fused.shape[0]

    # PyTorch nn.Embedding raises on out-of-range ids; we clamp instead so no
    # unchecked VMEM read can happen.
    ids = jnp.clip(x_id.reshape(-1).astype(jnp.int32), 0, v - 1)
    n = ids.shape[0]
    n_pad = tile_n * pl.cdiv(n, tile_n)
    ids_pad = jnp.zeros((n_pad,), jnp.int32).at[:n].set(ids)

    out = pl.pallas_call(
        _gather_kernel,
        out_shape=jax.ShapeDtypeStruct((n_pad, OUT_PAD), jnp.float32),
        grid_spec=pltpu.PrefetchScalarGridSpec(
            num_scalar_prefetch=1,              # ids land in SMEM
            grid=(n_pad // tile_n,),
            # Whole fused table resident in VMEM (V * 512 B).
            # TODO(synk): for very large vocabularies keep the table in
            # memory_space=pl.ANY and DMA only the gathered rows.
            in_specs=[pl.BlockSpec((v, OUT_PAD), lambda i, ids: (0, 0))],
            out_specs=pl.BlockSpec((tile_n, OUT_PAD), lambda i, ids: (i, 0)),
        ),
        compiler_params=pltpu.CompilerParams(
            dimension_semantics=("parallel",)),
    )(ids_pad, fused)

    return out[:n, :OUT_FEATURES].reshape(*orig_shape, OUT_FEATURES)


if __name__ == "__main__":
    key = jax.random.PRNGKey(0)
    k_emb, k_ids = jax.random.split(key)

    total_len = 32        # vocab size
    batch, seq = 2, 8

    # Parameters mirroring MLP3.__init__:
    #   nn.Embedding(total_len, 64) -> N(0,1) init (deterministic key here)
    #   nn.Linear(64, 10) with weight/bias filled to 0.01
    emb_table = jax.random.normal(k_emb, (total_len, EMB_DIM), dtype=jnp.float32)
    w = jnp.full((OUT_FEATURES, EMB_DIM), 0.01, dtype=jnp.float32)
    b = jnp.full((OUT_FEATURES,), 0.01, dtype=jnp.float32)

    x_id = jax.random.randint(k_ids, (batch, seq), 0, total_len, dtype=jnp.int32)

    # One-time parameter fusion (hoisted out of the per-call path), then forward.
    fused = jax.block_until_ready(fuse_params(emb_table, w, b))
    out = jax.block_until_ready(mlp3_forward(x_id, fused))

    # Cross-check against plain-JAX reference (same semantics as PyTorch).
    ref = jnp.take(emb_table, x_id, axis=0) @ w.T + b
    assert out.shape == (batch, seq, OUT_FEATURES)
    assert jnp.allclose(out, ref, atol=1e-5), "mismatch vs reference"

    print("KERNEL_OK")
</pallas_src>

<mosaic_0001>
module attributes {stable_mosaic.version = 11 : i64} {
  func.func @_fuse_kernel(%arg0: memref<32x64xf32, #tpu.memory_space<vmem>>, %arg1: memref<64x128xf32, #tpu.memory_space<vmem>>, %arg2: memref<1x128xf32, #tpu.memory_space<vmem>>, %arg3: memref<32x128xf32, #tpu.memory_space<vmem>>) attributes {dimension_semantics = [], scalar_prefetch = 0 : i64, scratch_operands = 0 : i64, tpu.core_type = #tpu.core_type<tc>} {
    %c0 = arith.constant 0 : index
    %c0_0 = arith.constant 0 : index
    %0 = vector.load %arg0[%c0, %c0_0] : memref<32x64xf32, #tpu.memory_space<vmem>>, vector<32x64xf32>
    %c0_1 = arith.constant 0 : index
    %c0_2 = arith.constant 0 : index
    %1 = vector.load %arg1[%c0_1, %c0_2] : memref<64x128xf32, #tpu.memory_space<vmem>>, vector<64x128xf32>
    %cst = arith.constant dense<0.000000e+00> : vector<32x128xf32>
    %2 = tpu.matmul %0, %1, %cst {dimension_numbers = #tpu.dot_dimension_numbers<[1], [0], [0], [1], [0, 0, 1, 1], [], []>} : vector<32x64xf32>, vector<64x128xf32>, vector<32x128xf32> -> vector<32x128xf32>
    %c0_3 = arith.constant 0 : index
    %c0_4 = arith.constant 0 : index
    %3 = vector.load %arg2[%c0_3, %c0_4] : memref<1x128xf32, #tpu.memory_space<vmem>>, vector<1x128xf32>
    %4 = vector.broadcast %3 : vector<1x128xf32> to vector<32x128xf32>
    %5 = arith.addf %2, %4 : vector<32x128xf32>
    %c0_5 = arith.constant 0 : index
    %c0_6 = arith.constant 0 : index
    %6 = vector.load %arg3[%c0_5, %c0_6] : memref<32x128xf32, #tpu.memory_space<vmem>>, vector<32x128xf32>
    tpu.vector_store %arg3[%c0_5, %c0_6], %5 {strides = array<i32>} : memref<32x128xf32, #tpu.memory_space<vmem>>, vector<32x128xf32>,
    return
  }
}

</mosaic_0001>

<bundles_post_ra>
// kernel: tpu_custom_call.1
= control target key start
LH: loop header
LB: loop body
LE: loop exit
PB: predicated region body
PF: predicated region fallthrough
CT: control target
= control target key end

     0   :  { %8 = vsyncpa [#allocation3], 0  ;;  %s287_s0 = inlined_call_operand.hbm [shape: f32[32,64], index: 0, kind: input, shape index: {}]   ;;  %s288_s1 = inlined_call_operand.hbm [shape: f32[64,128], index: 1, kind: input, shape index: {}]   ;;  %s289_s2 = inlined_call_operand.vmem [shape: f32[1,128], index: 2, kind: input, shape index: {}]   ;;  %s290_s3 = inlined_call_operand.hbm [shape: f32[32,128], index: 3, kind: output, shape index: {}]  }
   0x1   :  { %9 = vsyncpa [#allocation6], 0 }
   0x2   :  { %10 = vsyncpa [#allocation4], 0  ;;  %s15_s14 = sshll.u32 %s287_s0, 4  ;;  %s241_s15 = smov [#allocation2]   ;;  %s16_s14 = int_to_ptr.hbm [resolvable:$true] %s15_s14 }
   0x3   :  { %s17_s16 = sshll.u32 %s241_s15, 4  ;;  %s28_s19 = sshll.u32 %s288_s1, 4  ;;  %s18_s16 = int_to_ptr.vmem [resolvable:$true] %s17_s16  ;;  %s29_s19 = int_to_ptr.hbm [resolvable:$true] %s28_s19 }
   0x4   :  { %s242_s20 = smov 128   ;;  %s243_s21 = smov 8  }
   0x5   :  { %23 = dma.hbm_to_vmem [thread:$0]  %s16_s14, 512, %s18_s16, [#allocation3], %s242_s20, %s242_s20, %s243_s21  }
   0x6   :  { %s244_s22 = smov [#allocation5]  }
   0x7   :  { %s30_s23 = sshll.u32 %s244_s22, 4  ;;  %s31_s23 = int_to_ptr.vmem [resolvable:$true] %s30_s23 }
   0x8   :  { %36 = dma.hbm_to_vmem [thread:$0]  %s29_s19, 1024, %s31_s23, [#allocation6], %s242_s20, %s242_s20, %s243_s21  }
   0x9   :  { %235 = dma.done.wait [#allocation3], 512  }
   0xa   :  { %236 = vsyncadd [#allocation3], 4294966784 }
   0xb   :  { %237 = dma.done.wait [#allocation6], 1024  }
   0xc   :  { %238 = vsyncadd [#allocation6], 4294966272  ;;  %v58_v0 = vld [vmem:[#allocation5 + $0x38] sm:$0xff]  ;;  %v57_v1 = vld [vmem:[#allocation5 + $0x30] sm:$0xff]  ;;  %vm63_vm0 = vcmask 523264   ;;  %s245_s24 = smov [#allocation7]  }
   0xd   :  { %134 = vmatpush.msra.mxu2 %v58_v0  ;;  %135 = vmatpush.msra.mxu3 %v58_v0  ;;  %v56_v2 = vld [vmem:[#allocation5 + $0x28] sm:$0xff]  ;;  %v55_v3 = vld [vmem:[#allocation5 + $0x20] sm:$0xff]  ;;  %v54_v4 = vld [vmem:[#allocation5 + $0x18] sm:$0xff]  ;;  %s113_s25 = sshll.u32 %s245_s24, 4  ;;  %s115_s28 = sshll.u32 %s290_s3, 4  ;;  %s114_s25 = int_to_ptr.vmem [resolvable:$true] %s113_s25  ;;  %s116_s28 = int_to_ptr.hbm [resolvable:$true] %s115_s28 }
   0xe   :  { %84 = vmatpush.msra.mxu0 %v58_v0  ;;  %133 = vmatpush.msra.mxu1 %v58_v0  ;;  %v53_v5 = vld [vmem:[#allocation5 + $0x10] sm:$0xff]  ;;  %v52_v6 = vld [vmem:[#allocation5 + $0x8] sm:$0xff]  ;;  %v51_v7 = vld [vmem:[#allocation5] sm:$0xff] }
   0xf   :  { %137 = vmatpush.msra.mxu2 %v57_v1  ;;  %138 = vmatpush.msra.mxu3 %v57_v1  ;;  %v49_v8 = vld [vmem:[#allocation2 + $0x10] sm:$0xff]  ;;  %v50_v9 = vld [vmem:[#allocation2 + $0x18] sm:$0xff]  ;;  %v47_v10 = vld [vmem:[#allocation2] sm:$0xff] }
  0x10   :  { %85 = vmatpush.msra.mxu0 %v57_v1  ;;  %136 = vmatpush.msra.mxu1 %v57_v1  ;;  %v48_v11 = vld [vmem:[#allocation2 + $0x8] sm:$0xff]  ;;  %v162_v12 = vld [vmem:[%s289_s2] ss:$0 sm:$0xff] }
  0x11   :  { %140 = vmatpush.msra.mxu2 %v56_v2  ;;  %141 = vmatpush.msra.mxu3 %v56_v2 }
  0x12   :  { %86 = vmatpush.msra.mxu0 %v56_v2  ;;  %139 = vmatpush.msra.mxu1 %v56_v2 }
  0x13   :  { %143 = vmatpush.msra.mxu2 %v55_v3  ;;  %144 = vmatpush.msra.mxu3 %v55_v3 }
  0x14   :  { %87 = vmatpush.msra.mxu0 %v55_v3  ;;  %142 = vmatpush.msra.mxu1 %v55_v3 }
  0x15   :  { %146 = vmatpush.msra.mxu2 %v54_v4  ;;  %147 = vmatpush.msra.mxu3 %v54_v4 }
  0x16   :  { %88 = vmatpush.msra.mxu0 %v54_v4  ;;  %145 = vmatpush.msra.mxu1 %v54_v4 }
  0x17   :  { %149 = vmatpush.msra.mxu2 %v53_v5  ;;  %150 = vmatpush.msra.mxu3 %v53_v5 }
  0x18   :  { %89 = vmatpush.msra.mxu0 %v53_v5  ;;  %148 = vmatpush.msra.mxu1 %v53_v5 }
  0x19   :  { %152 = vmatpush.msra.mxu2 %v52_v6  ;;  %153 = vmatpush.msra.mxu3 %v52_v6 }
  0x1a   :  { %90 = vmatpush.msra.mxu0 %v52_v6  ;;  %151 = vmatpush.msra.mxu1 %v52_v6 }
  0x1b   :  { %155 = vmatpush.msra.mxu2 %v51_v7  ;;  %156 = vmatpush.msra.mxu3 %v51_v7 }
  0x1c   :  { %131 = vmatmul.msk.f32.vlgmr.msra.gmra.mxu2 %vm63_vm0, %v49_v8  ;;  %132 = vmatmul.msk.f32.vlgmr.msra.gmra.mxu3 %vm63_vm0, %v50_v9 }
  0x1d   :  { %91 = vmatpush.msra.mxu0 %v51_v7  ;;  %154 = vmatpush.msra.mxu1 %v51_v7 }
  0x1e   :  { %129 = vmatmul.msk.f32.vlgmr.msra.gmra.mxu0 %vm63_vm0, %v47_v10  ;;  %130 = vmatmul.msk.f32.vlgmr.msra.gmra.mxu1 %vm63_vm0, %v48_v11 }
  0x9b   :  { %v93_v13 = vpop.f32.mrf.mxu0  ;;  %v96_v14 = vpop.f32.mrf.mxu1 }
  0x9c   :  { %v94_v15 = vadd.f32 %v162_v12, %v93_v13  ;;  %v97_v16 = vadd.f32 %v162_v12, %v96_v14 }
  0x9e   :  { %105 = vst [vmem:[#allocation7] sm:$0xff] %v94_v15 }
  0x9f   :  { %106 = vst [vmem:[#allocation7 + $0x8] sm:$0xff] %v97_v16  ;;  %v99_v17 = vpop.f32.mrf.mxu2  ;;  %v102_v18 = vpop.f32.mrf.mxu3 }
  0xa0   :  { %v100_v19 = vadd.f32 %v162_v12, %v99_v17  ;;  %v103_v20 = vadd.f32 %v162_v12, %v102_v18 }
  0xa2   :  { %107 = vst [vmem:[#allocation7 + $0x10] sm:$0xff] %v100_v19 }
  0xa3   :  { %108 = vst [vmem:[#allocation7 + $0x18] sm:$0xff] %v103_v20 }
  0xa4   :  { %121 = dma.vmem_to_hbm [thread:$0]  %s114_s25, 512, %s116_s28, [#allocation4], %s242_s20, %s242_s20, %s243_s21  }
  0xa5   :  { %239 = dma.done.wait [#allocation4], 512  }
  0xa6   :  { %240 = vsyncadd [#allocation4], 4294966784 }
  0xa7   :  { %126 = vsyncpa [#allocation3], 1 }
  0xa8   :  { %127 = vsyncpa [#allocation6], 1 }
  0xa9   :  { %128 = vsyncpa [#allocation4], 1 }

</bundles_post_ra>
